<compile_context>
chip_gen: v7x
topology: tpu7x:2x2x1
jax: 0.10.0
libtpu: 0.0.40
codegen_flags: <defaults>
</compile_context>

<pallas_src>
import numpy as np
import jax
import jax.numpy as jnp
from jax.experimental import pallas as pl
from jax.experimental.pallas import tpu as pltpu


def _linear_interp_matrix(src_len: int, dst_len: int) -> np.ndarray:
    """W[s, n] such that out[:, n] = sum_s in[:, s] * W[s, n].

    Matches torch.nn.functional.interpolate(mode='linear', align_corners=False),
    including the negative-coordinate clamp.
    """
    W = np.zeros((src_len, dst_len), dtype=np.float32)
    scale = src_len / dst_len
    for n in range(dst_len):
        coord = (n + 0.5) * scale - 0.5
        coord = max(coord, 0.0)
        i0 = min(int(np.floor(coord)), src_len - 1)
        i1 = min(i0 + 1, src_len - 1)
        lam = coord - i0
        W[i0, n] += 1.0 - lam
        W[i1, n] += lam
    return W


# Per-x-tile byte budget.  The pipeline holds ~2x(x tile) + 2x(out tile)
# + 2x(interp tile) in VMEM, so the real working set is ~4-8x this number;
# 3 MiB keeps it safely under every generation's scoped default while still
# hitting ~85% of HBM roofline (streaming add saturates around 1-4 MiB steps).
_X_TILE_BUDGET = 3 << 20
_X_TILE_TARGET = 2 << 20     # per-step size that amortizes the ~0.35 us step overhead
_VMEM_LIMIT = 32 << 20       # explicit scoped-VMEM limit; safe on v5e/v6e/v7x


def _choose_tiles(B: int, C: int, N: int, itemsize: int):
    """Pick (tile_b, tile_c, tile_n) for the [B, C, N] layout.

    Last two block dims obey the TPU rule: multiple of (8, 128) or equal to
    the full array dim.
    """
    # Lane tile over N: largest divisor of N that is a multiple of 128 and
    # fits the budget with at least 8 sublanes; full N if N % 128 != 0.
    if N % 128 == 0:
        lane_cap = max(128, _X_TILE_BUDGET // (8 * itemsize))
        tile_n = 128
        for d in range(128, N + 1, 128):
            if N % d == 0 and d <= lane_cap:
                tile_n = d
    else:
        tile_n = N

    # Sublane tile over C: largest multiple-of-8 divisor of C (or C itself)
    # that fits the budget with one batch row.
    c_cands = sorted({d for d in range(8, C + 1, 8) if C % d == 0} | {C})
    tile_c = c_cands[0]
    for d in c_cands:
        if d * tile_n * itemsize <= _X_TILE_BUDGET:
            tile_c = d

    # Batch tile: grow until the per-step x bytes reach the target, stay under
    # the budget, and keep >= 2 total grid steps (v7x has 2 TensorCores) once
    # the steps are already big enough.
    per_b = tile_c * tile_n * itemsize
    tile_b = 1
    for d in sorted(d for d in range(1, B + 1) if B % d == 0):
        step_bytes = d * per_b
        if step_bytes > _X_TILE_BUDGET and d > 1:
            break
        n_steps = (B // d) * (C // tile_c) * (N // tile_n)
        if n_steps < 2 and step_bytes >= _X_TILE_TARGET and d > 1:
            break
        tile_b = d
        if step_bytes >= _X_TILE_TARGET:
            break
    return tile_b, tile_c, tile_n


def _bcast_add_kernel(x_ref, pos_ref, o_ref):
    # x_ref: (tile_b, tile_c, tile_n) in x.dtype
    # pos_ref: (tile_c, tile_n) f32, broadcast over the batch rows
    # o_ref: (tile_b, tile_c, tile_n)
    o_ref[...] = (x_ref[...].astype(jnp.float32) + pos_ref[...][None]).astype(o_ref.dtype)


def squeeze_axial_positional_embedding(x: jax.Array, pos_embed: jax.Array) -> jax.Array:
    """x: [B, C, N]; pos_embed: [1, C, S] -> x + resize(pos_embed, N)."""
    B, C, N = x.shape
    one, dim, S = pos_embed.shape
    assert one == 1 and dim == C, "pos_embed dim must match channel dim of x"

    # Hoisted, batch-independent resize (done ONCE, outside the Pallas grid):
    # interp[c, n] = sum_s pos_embed[0, c, s] * W[s, n]  -- exact linear interp.
    w = jnp.asarray(_linear_interp_matrix(S, N))                       # (S, N) static
    interp = jnp.dot(pos_embed[0].astype(jnp.float32), w,
                     preferred_element_type=jnp.float32)               # (C, N) f32

    itemsize = np.dtype(x.dtype).itemsize
    tile_b, tile_c, tile_n = _choose_tiles(B, C, N, itemsize)
    # Batch axis innermost so interp's block index (c, j) is invariant along
    # the fastest-varying grid axis -> interp stays VMEM-resident.
    grid = (N // tile_n, C // tile_c, B // tile_b)

    out = pl.pallas_call(
        _bcast_add_kernel,
        out_shape=jax.ShapeDtypeStruct((B, C, N), x.dtype),
        grid=grid,
        in_specs=[
            pl.BlockSpec((tile_b, tile_c, tile_n), lambda j, c, b: (b, c, j)),  # x
            pl.BlockSpec((tile_c, tile_n), lambda j, c, b: (c, j)),             # interp
        ],
        out_specs=pl.BlockSpec((tile_b, tile_c, tile_n), lambda j, c, b: (b, c, j)),
        compiler_params=pltpu.CompilerParams(
            dimension_semantics=("parallel", "parallel", "parallel"),
            vmem_limit_bytes=_VMEM_LIMIT),
        cost_estimate=pl.CostEstimate(
            flops=B * C * N,
            transcendentals=0,
            bytes_accessed=2 * B * C * N * itemsize + C * N * 4),
    )(x, interp)

    return out


if __name__ == "__main__":
    # Small, module-consistent shapes: dim=C=16, pos_embed length S=16, seq N=64.
    B, C, N, S = 2, 16, 64, 16

    key = jax.random.PRNGKey(0)
    kx, kp = jax.random.split(key)
    x = jax.random.normal(kx, (B, C, N), dtype=jnp.float32)
    # Deterministic "parameter" init (stands in for torch.randn in __init__).
    pos_embed = jax.random.normal(kp, (1, C, S), dtype=jnp.float32)

    out = squeeze_axial_positional_embedding(x, pos_embed)
    out = jax.block_until_ready(out)

    # Pure-JAX reference using the same (exact) interpolation matrix.
    w_ref = jnp.asarray(_linear_interp_matrix(S, N))
    interp_ref = jnp.einsum("cs,sn->cn", pos_embed[0], w_ref)
    ref = x + interp_ref[None]
    np.testing.assert_allclose(np.asarray(out), np.asarray(ref), rtol=1e-5, atol=1e-5)

    assert out.shape == (B, C, N)
    print("KERNEL_OK")
</pallas_src>

<mosaic_0001>
module attributes {stable_mosaic.version = 11 : i64} {
  func.func @_bcast_add_kernel(%arg0: i32, %arg1: i32, %arg2: i32, %arg3: memref<2x16x64xf32, #tpu.memory_space<vmem>>, %arg4: memref<16x64xf32, #tpu.memory_space<vmem>>, %arg5: memref<2x16x64xf32, #tpu.memory_space<vmem>>) attributes {dimension_semantics = [#tpu.dimension_semantics<parallel>, #tpu.dimension_semantics<parallel>, #tpu.dimension_semantics<parallel>], iteration_bounds = array<i64: 1, 1, 1>, scalar_prefetch = 0 : i64, scratch_operands = 0 : i64, tpu.core_type = #tpu.core_type<tc>, window_params = [{transform_indices = @transform_0, window_bounds = array<i64: 2, 16, 64>}, {transform_indices = @transform_1, window_bounds = array<i64: 16, 64>}, {transform_indices = @transform_2, window_bounds = array<i64: 2, 16, 64>}]} {
    %c0 = arith.constant 0 : index
    %c0_0 = arith.constant 0 : index
    %c0_1 = arith.constant 0 : index
    %0 = vector.load %arg3[%c0, %c0_0, %c0_1] : memref<2x16x64xf32, #tpu.memory_space<vmem>>, vector<2x16x64xf32>
    %c0_2 = arith.constant 0 : index
    %c0_3 = arith.constant 0 : index
    %1 = vector.load %arg4[%c0_2, %c0_3] : memref<16x64xf32, #tpu.memory_space<vmem>>, vector<16x64xf32>
    %2 = vector.shape_cast %1 : vector<16x64xf32> to vector<1x16x64xf32>
    %3 = vector.broadcast %2 : vector<1x16x64xf32> to vector<2x16x64xf32>
    %4 = arith.addf %0, %3 : vector<2x16x64xf32>
    %c0_4 = arith.constant 0 : index
    %c0_5 = arith.constant 0 : index
    %c0_6 = arith.constant 0 : index
    %5 = vector.load %arg5[%c0_4, %c0_5, %c0_6] : memref<2x16x64xf32, #tpu.memory_space<vmem>>, vector<2x16x64xf32>
    tpu.vector_store %arg5[%c0_4, %c0_5, %c0_6], %4 {strides = array<i32>} : memref<2x16x64xf32, #tpu.memory_space<vmem>>, vector<2x16x64xf32>,
    return
  }
  func.func @transform_0(%arg0: i32, %arg1: i32, %arg2: i32) -> (i32, i32, i32) {
    %c0_i32 = arith.constant 0 : i32
    return %arg2, %arg1, %arg0 : i32, i32, i32
  }
  func.func @transform_1(%arg0: i32, %arg1: i32, %arg2: i32) -> (i32, i32) {
    %c0_i32 = arith.constant 0 : i32
    return %arg1, %arg0 : i32, i32
  }
  func.func @transform_2(%arg0: i32, %arg1: i32, %arg2: i32) -> (i32, i32, i32) {
    %c0_i32 = arith.constant 0 : i32
    return %arg2, %arg1, %arg0 : i32, i32, i32
  }
}

</mosaic_0001>

<bundles_post_ra>
// kernel: tpu_custom_call.1
= control target key start
LH: loop header
LB: loop body
LE: loop exit
PB: predicated region body
PF: predicated region fallthrough
CT: control target
= control target key end

     0   :  { %7 = vsyncpa [#allocation3], 0  ;;  %s215_s0 = inlined_call_operand.hbm [shape: f32[2,16,64], index: 0, kind: input, shape index: {}]   ;;  %s216_s1 = inlined_call_operand.hbm [shape: f32[16,64], index: 1, kind: input, shape index: {}]   ;;  %s217_s2 = inlined_call_operand.hbm [shape: f32[2,16,64], index: 2, kind: output, shape index: {}]  }
   0x1   :  { %8 = vsyncpa [#allocation6], 0 }
   0x2   :  { %9 = vsyncpa [#allocation4], 0  ;;  %s150_s9 = smov [#allocation2]   ;;  %s78_s13 = scalar_lea.hbm %s215_s0, 512 }
   0x3   :  { %s15_s10 = sshll.u32 %s150_s9, 4  ;;  %p79_p0 = scmp.ne.s32.totalorder %s215_s0, %s78_s13  ;;  %s16_s10 = int_to_ptr.vmem [resolvable:$true] %s15_s10 }
   0x4   :  { %p82_p1 = scmp.lt.u32.totalorder %s78_s13, %s215_s0 }
   0x6   :  { %p84_p2 = pnand %p82_p1, %p79_p0 }
   0x8   :  { %87 = shalt.err (!%p84_p2)
}
   0x9   :  { %s88_s18 = scalar_lea.vmem %s16_s10, 512  ;;  %p93_p4 = scmp.lt.s32.totalorder %s16_s10, %s16_s10 }
   0xa   :  { %p89_p3 = scmp.ne.s32.totalorder %s16_s10, %s88_s18  ;;  %p94_p5 = scmp.lt.s32.totalorder %s88_s18, %s88_s18 }
   0xc   :  { %p95_p6 = por %p94_p5, %p93_p4 }
   0xe   :  { %p96_p7 = pnand %p95_p6, %p89_p3 }
  0x10   :  { %99 = shalt.err (!%p96_p7)
}
  0x11   :  { %s151_s19 = smov 128   ;;  %s152_s20 = smov 8  }
  0x12   :  { %21 = dma.hbm_to_vmem [thread:$0]  %s215_s0, 512, %s16_s10, [#allocation3], %s151_s19, %s151_s19, %s152_s20  }
  0x13   :  { %s153_s23 = smov [#allocation5]   ;;  %s100_s27 = scalar_lea.hbm %s216_s1, 256 }
  0x14   :  { %s27_s24 = sshll.u32 %s153_s23, 4  ;;  %p101_p8 = scmp.ne.s32.totalorder %s216_s1, %s100_s27  ;;  %s28_s24 = int_to_ptr.vmem [resolvable:$true] %s27_s24 }
  0x15   :  { %p104_p9 = scmp.lt.u32.totalorder %s100_s27, %s216_s1 }
  0x17   :  { %p106_p10 = pnand %p104_p9, %p101_p8 }
  0x19   :  { %109 = shalt.err (!%p106_p10)
}
  0x1a   :  { %s110_s4 = scalar_lea.vmem %s28_s24, 256  ;;  %p115_p12 = scmp.lt.s32.totalorder %s28_s24, %s28_s24 }
  0x1b   :  { %p111_p11 = scmp.ne.s32.totalorder %s28_s24, %s110_s4  ;;  %p116_p13 = scmp.lt.s32.totalorder %s110_s4, %s110_s4 }
  0x1d   :  { %p117_p0 = por %p116_p13, %p115_p12 }
  0x1f   :  { %p118_p1 = pnand %p117_p0, %p111_p11 }
  0x21   :  { %121 = shalt.err (!%p118_p1)
}
  0x22   :  { %33 = dma.hbm_to_vmem [thread:$0]  %s216_s1, 256, %s28_s24, [#allocation6], %s151_s19, %s151_s19, %s152_s20  }
  0x23   :  { %144 = dma.done.wait [#allocation3], 512  }
  0x24   :  { %145 = vsyncadd [#allocation3], 4294966784 }
  0x25   :  { %146 = dma.done.wait [#allocation6], 256  }
  0x26   :  { %147 = vsyncadd [#allocation6], 4294967040  ;;  %s154_s6 = smov [#allocation7]   ;;  %v40_v0 = vld [vmem:[#allocation2] sm:$0xff]  ;;  %vm50_vm0 = vcmask 523264   ;;  %v41_v2 = vld [vmem:[#allocation2 + $0x8] sm:$0xff] }
  0x27   :  { %s60_s7 = sshll.u32 %s154_s6, 4  ;;  %v44_v1 = vld [vmem:[#allocation5] sm:$0xff]  ;;  %v45_v4 = vld [vmem:[#allocation5 + $0x8] sm:$0xff]  ;;  %v42_v5 = vld [vmem:[#allocation2 + $0x10] sm:$0xff]  ;;  %s61_s7 = int_to_ptr.vmem [resolvable:$true] %s60_s7 }
  0x28   :  { %v46_v3 = vadd.f32 %v44_v1, %v40_v0  ;;  %v43_v6 = vld [vmem:[#allocation2 + $0x18] sm:$0xff]  ;;  %v47_v7 = vadd.f32 %v45_v4, %v41_v2  ;;  %v48_v8 = vadd.f32 %v44_v1, %v42_v5  ;;  %s122_s1 = scalar_lea.vmem %s61_s7, 512  ;;  %p127_p3 = scmp.lt.s32.totalorder %s61_s7, %s61_s7 }
  0x29   :  { %v49_v9 = vadd.f32 %v45_v4, %v43_v6  ;;  %p123_p2 = scmp.ne.s32.totalorder %s61_s7, %s122_s1  ;;  %p128_p4 = scmp.lt.s32.totalorder %s122_s1, %s122_s1 }
  0x2a   :  { %51 = vst.msk [vmem:[#allocation7] sm:$0xff] %vm50_vm0, %v46_v3  ;;  %52 = vst.msk [vmem:[#allocation7 + $0x8] sm:$0xff] %vm50_vm0, %v47_v7 }
  0x2b   :  { %53 = vst.msk [vmem:[#allocation7 + $0x10] sm:$0xff] %vm50_vm0, %v48_v8  ;;  %54 = vst.msk [vmem:[#allocation7 + $0x18] sm:$0xff] %vm50_vm0, %v49_v9  ;;  %p129_p5 = por %p128_p4, %p127_p3 }
  0x2d   :  { %p130_p6 = pnand %p129_p5, %p123_p2 }
  0x2f   :  { %133 = shalt.err (!%p130_p6)
}
  0x30   :  { %s134_s10 = scalar_lea.hbm %s217_s2, 512 }
  0x31   :  { %p135_p7 = scmp.ne.s32.totalorder %s217_s2, %s134_s10  ;;  %p138_p8 = scmp.lt.u32.totalorder %s134_s10, %s217_s2 }
  0x33   :  { %p140_p9 = pnand %p138_p8, %p135_p7 }
  0x35   :  { %143 = shalt.err (!%p140_p9)
}
  0x36   :  { %66 = dma.vmem_to_hbm [thread:$0]  %s61_s7, 512, %s217_s2, [#allocation4], %s151_s19, %s151_s19, %s152_s20  }
  0x37   :  { %148 = dma.done.wait [#allocation4], 512  }
  0x38   :  { %149 = vsyncadd [#allocation4], 4294966784 }
  0x39   :  { %70 = vsyncpa [#allocation3], 1 }
  0x3a   :  { %71 = vsyncpa [#allocation6], 1 }
  0x3b   :  { %72 = vsyncpa [#allocation4], 1 }

</bundles_post_ra>
